<compile_context>
chip_gen: v6e
topology: v6e:2x2x1
jax: 0.10.0
libtpu: 0.0.40
codegen_flags: <defaults>
</compile_context>

<pallas_src>
import math
from functools import partial

import jax
import jax.numpy as jnp
from jax.experimental import pallas as pl
from jax.experimental.pallas import tpu as pltpu


def _make_critic_kernel(matmul_dtype=None):
    """matmul_dtype: None (keep input dtype) or e.g. jnp.bfloat16 for the MXU
    operands only (accumulation stays f32, bias/ReLU stay f32)."""
    cast = (lambda x: x) if matmul_dtype is None else (lambda x: x.astype(matmul_dtype))

    def _critic_kernel(s_ref, a_ref,
                       w1s_ref, w1a_ref, b1_ref,
                       w2_ref, b2_ref,
                       w3_ref, b3_ref,
                       o_ref):
        # First layer as two dots (avoids lane-axis concat / relayout copy).
        h1 = (jnp.dot(cast(s_ref[...]), cast(w1s_ref[...]),
                      preferred_element_type=jnp.float32)
              + jnp.dot(cast(a_ref[...]), cast(w1a_ref[...]),
                        preferred_element_type=jnp.float32)
              + b1_ref[...])
        h1 = jnp.maximum(h1, 0.0)

        # Second layer -> ReLU.
        h2 = jnp.dot(cast(h1), cast(w2_ref[...]),
                     preferred_element_type=jnp.float32) + b2_ref[...]
        h2 = jnp.maximum(h2, 0.0)

        # Final layer (output padded to 128 lanes -> unmasked vst).
        q = jnp.dot(cast(h2), cast(w3_ref[...]),
                    preferred_element_type=jnp.float32) + b3_ref[...]
        o_ref[...] = q.astype(o_ref.dtype)

    return _critic_kernel


_OUT_LANES = 128  # lane-dense padded width of the final layer


def critic_forward(state, action, params, *, tb_max=1024, matmul_dtype=None):
    """Pallas wrapper: batched MLP Q(s, a) with a grid over the batch axis."""
    (w1, b1), (w2, b2), (w3, b3) = params
    B, state_dim = state.shape
    action_dim = action.shape[1]

    # Split first-layer weights so the kernel never concatenates on the lane axis.
    w1_s = w1[:state_dim]
    w1_a = w1[state_dim:]

    # Zero-pad the last layer to 128 output columns (lane-dense stores).
    w3_p = jnp.pad(w3, ((0, 0), (0, _OUT_LANES - w3.shape[1])))
    b3_p = jnp.pad(b3, ((0, 0), (0, _OUT_LANES - b3.shape[1])))

    # Batch tiling: tile rows must be a multiple of 8 (sublane); pad batch.
    b8 = -(-B // 8) * 8
    tb = min(tb_max, b8)
    b_pad = -(-b8 // tb) * tb
    if b_pad != B:
        pad = b_pad - B
        state = jnp.pad(state, ((0, pad), (0, 0)))
        action = jnp.pad(action, ((0, pad), (0, 0)))

    grid = (b_pad // tb,)

    def batch_spec(feat):
        return pl.BlockSpec((tb, feat), lambda i: (i, 0))

    def const_spec(arr):
        # Full-array block, constant index -> DMA'd once, VMEM-resident.
        return pl.BlockSpec(arr.shape, lambda i: (0, 0))

    q_pad = pl.pallas_call(
        _make_critic_kernel(matmul_dtype),
        out_shape=jax.ShapeDtypeStruct((b_pad, _OUT_LANES), jnp.float32),
        grid=grid,
        in_specs=[
            batch_spec(state_dim), batch_spec(action_dim),
            const_spec(w1_s), const_spec(w1_a), const_spec(b1),
            const_spec(w2), const_spec(b2),
            const_spec(w3_p), const_spec(b3_p),
        ],
        out_specs=batch_spec(_OUT_LANES),
        compiler_params=pltpu.CompilerParams(
            dimension_semantics=("parallel",)),
    )(state, action, w1_s, w1_a, b1, w2, b2, w3_p, b3_p)

    # Strip batch padding and the 127 zero lanes.
    return q_pad[:B, :1]


def init_critic_params(key, state_dim, action_dim, hidden_dims=(32, 32)):
    """Deterministic init mimicking PyTorch nn.Linear default
    U(-1/sqrt(fan_in), 1/sqrt(fan_in)). Weights stored transposed (in, out)."""
    dims = [state_dim + action_dim] + list(hidden_dims) + [1]
    params = []
    for i in range(len(dims) - 1):
        fan_in, fan_out = dims[i], dims[i + 1]
        key, kw, kb = jax.random.split(key, 3)
        bound = 1.0 / math.sqrt(fan_in)
        w = jax.random.uniform(kw, (fan_in, fan_out), jnp.float32, -bound, bound)
        b = jax.random.uniform(kb, (1, fan_out), jnp.float32, -bound, bound)
        params.append((w, b))
    return params


def critic_forward_ref(state, action, params):
    """Pure-JAX reference for correctness checking."""
    x = jnp.concatenate([state, action], axis=1)
    (w1, b1), (w2, b2), (w3, b3) = params
    x = jnp.maximum(x @ w1 + b1, 0.0)
    x = jnp.maximum(x @ w2 + b2, 0.0)
    return x @ w3 + b3


if __name__ == "__main__":
    key = jax.random.PRNGKey(0)
    k_state, k_action, k_params = jax.random.split(key, 3)

    batch = 2
    state_dim = 12
    action_dim = 4
    hidden_dims = (32, 32)

    state = jax.random.normal(k_state, (batch, state_dim), jnp.float32)
    action = jax.random.normal(k_action, (batch, action_dim), jnp.float32)
    params = init_critic_params(k_params, state_dim, action_dim, hidden_dims)

    q = critic_forward(state, action, params)
    q = jax.block_until_ready(q)

    q_ref = critic_forward_ref(state, action, params)
    assert q.shape == (batch, 1), q.shape
    assert jnp.allclose(q, q_ref, atol=1e-5, rtol=1e-5), (q, q_ref)

    # TODO(synk): twin-critic (Q1/Q2) weight fusion skipped — the reference
    # module is a single Critic; fusing would change forward semantics.

    print("KERNEL_OK")
</pallas_src>

<mosaic_0001>
module attributes {stable_mosaic.version = 11 : i64} {
  func.func @_critic_kernel(%arg0: i32, %arg1: memref<8x12xf32, #tpu.memory_space<vmem>>, %arg2: memref<8x4xf32, #tpu.memory_space<vmem>>, %arg3: memref<12x32xf32, #tpu.memory_space<vmem>>, %arg4: memref<4x32xf32, #tpu.memory_space<vmem>>, %arg5: memref<1x32xf32, #tpu.memory_space<vmem>>, %arg6: memref<32x32xf32, #tpu.memory_space<vmem>>, %arg7: memref<1x32xf32, #tpu.memory_space<vmem>>, %arg8: memref<32x128xf32, #tpu.memory_space<vmem>>, %arg9: memref<1x128xf32, #tpu.memory_space<vmem>>, %arg10: memref<8x128xf32, #tpu.memory_space<vmem>>) attributes {dimension_semantics = [#tpu.dimension_semantics<parallel>], iteration_bounds = array<i64: 1>, scalar_prefetch = 0 : i64, scratch_operands = 0 : i64, tpu.core_type = #tpu.core_type<tc>, window_params = [{transform_indices = @transform_0, window_bounds = array<i64: 8, 12>}, {transform_indices = @transform_1, window_bounds = array<i64: 8, 4>}, {pipeline_mode = #tpu.pipeline_mode<synchronous>, transform_indices = @transform_2, window_bounds = array<i64: 12, 32>}, {pipeline_mode = #tpu.pipeline_mode<synchronous>, transform_indices = @transform_3, window_bounds = array<i64: 4, 32>}, {pipeline_mode = #tpu.pipeline_mode<synchronous>, transform_indices = @transform_4, window_bounds = array<i64: 1, 32>}, {pipeline_mode = #tpu.pipeline_mode<synchronous>, transform_indices = @transform_5, window_bounds = array<i64: 32, 32>}, {pipeline_mode = #tpu.pipeline_mode<synchronous>, transform_indices = @transform_6, window_bounds = array<i64: 1, 32>}, {pipeline_mode = #tpu.pipeline_mode<synchronous>, transform_indices = @transform_7, window_bounds = array<i64: 32, 128>}, {pipeline_mode = #tpu.pipeline_mode<synchronous>, transform_indices = @transform_8, window_bounds = array<i64: 1, 128>}, {transform_indices = @transform_9, window_bounds = array<i64: 8, 128>}]} {
    %c0 = arith.constant 0 : index
    %c0_0 = arith.constant 0 : index
    %0 = vector.load %arg1[%c0, %c0_0] : memref<8x12xf32, #tpu.memory_space<vmem>>, vector<8x12xf32>
    %c0_1 = arith.constant 0 : index
    %c0_2 = arith.constant 0 : index
    %1 = vector.load %arg3[%c0_1, %c0_2] : memref<12x32xf32, #tpu.memory_space<vmem>>, vector<12x32xf32>
    %cst = arith.constant dense<0.000000e+00> : vector<8x32xf32>
    %2 = tpu.matmul %0, %1, %cst {dimension_numbers = #tpu.dot_dimension_numbers<[1], [0], [0], [1], [0, 0, 1, 1], [], []>} : vector<8x12xf32>, vector<12x32xf32>, vector<8x32xf32> -> vector<8x32xf32>
    %c0_3 = arith.constant 0 : index
    %c0_4 = arith.constant 0 : index
    %3 = vector.load %arg2[%c0_3, %c0_4] : memref<8x4xf32, #tpu.memory_space<vmem>>, vector<8x4xf32>
    %c0_5 = arith.constant 0 : index
    %c0_6 = arith.constant 0 : index
    %4 = vector.load %arg4[%c0_5, %c0_6] : memref<4x32xf32, #tpu.memory_space<vmem>>, vector<4x32xf32>
    %cst_7 = arith.constant dense<0.000000e+00> : vector<8x32xf32>
    %5 = tpu.matmul %3, %4, %cst_7 {dimension_numbers = #tpu.dot_dimension_numbers<[1], [0], [0], [1], [0, 0, 1, 1], [], []>} : vector<8x4xf32>, vector<4x32xf32>, vector<8x32xf32> -> vector<8x32xf32>
    %6 = arith.addf %2, %5 : vector<8x32xf32>
    %c0_8 = arith.constant 0 : index
    %c0_9 = arith.constant 0 : index
    %7 = vector.load %arg5[%c0_8, %c0_9] : memref<1x32xf32, #tpu.memory_space<vmem>>, vector<1x32xf32>
    %8 = vector.broadcast %7 : vector<1x32xf32> to vector<8x32xf32>
    %9 = arith.addf %6, %8 : vector<8x32xf32>
    %cst_10 = arith.constant 0.000000e+00 : f32
    %10 = vector.broadcast %cst_10 : f32 to vector<8x32xf32>
    %11 = arith.maximumf %9, %10 : vector<8x32xf32>
    %c0_11 = arith.constant 0 : index
    %c0_12 = arith.constant 0 : index
    %12 = vector.load %arg6[%c0_11, %c0_12] : memref<32x32xf32, #tpu.memory_space<vmem>>, vector<32x32xf32>
    %cst_13 = arith.constant dense<0.000000e+00> : vector<8x32xf32>
    %13 = tpu.matmul %11, %12, %cst_13 {dimension_numbers = #tpu.dot_dimension_numbers<[1], [0], [0], [1], [0, 0, 1, 1], [], []>} : vector<8x32xf32>, vector<32x32xf32>, vector<8x32xf32> -> vector<8x32xf32>
    %c0_14 = arith.constant 0 : index
    %c0_15 = arith.constant 0 : index
    %14 = vector.load %arg7[%c0_14, %c0_15] : memref<1x32xf32, #tpu.memory_space<vmem>>, vector<1x32xf32>
    %15 = vector.broadcast %14 : vector<1x32xf32> to vector<8x32xf32>
    %16 = arith.addf %13, %15 : vector<8x32xf32>
    %cst_16 = arith.constant 0.000000e+00 : f32
    %17 = vector.broadcast %cst_16 : f32 to vector<8x32xf32>
    %18 = arith.maximumf %16, %17 : vector<8x32xf32>
    %c0_17 = arith.constant 0 : index
    %c0_18 = arith.constant 0 : index
    %19 = vector.load %arg8[%c0_17, %c0_18] : memref<32x128xf32, #tpu.memory_space<vmem>>, vector<32x128xf32>
    %cst_19 = arith.constant dense<0.000000e+00> : vector<8x128xf32>
    %20 = tpu.matmul %18, %19, %cst_19 {dimension_numbers = #tpu.dot_dimension_numbers<[1], [0], [0], [1], [0, 0, 1, 1], [], []>} : vector<8x32xf32>, vector<32x128xf32>, vector<8x128xf32> -> vector<8x128xf32>
    %c0_20 = arith.constant 0 : index
    %c0_21 = arith.constant 0 : index
    %21 = vector.load %arg9[%c0_20, %c0_21] : memref<1x128xf32, #tpu.memory_space<vmem>>, vector<1x128xf32>
    %22 = vector.broadcast %21 : vector<1x128xf32> to vector<8x128xf32>
    %23 = arith.addf %20, %22 : vector<8x128xf32>
    %c0_22 = arith.constant 0 : index
    %c0_23 = arith.constant 0 : index
    %24 = vector.load %arg10[%c0_22, %c0_23] : memref<8x128xf32, #tpu.memory_space<vmem>>, vector<8x128xf32>
    tpu.vector_store %arg10[%c0_22, %c0_23], %23 {strides = array<i32>} : memref<8x128xf32, #tpu.memory_space<vmem>>, vector<8x128xf32>,
    return
  }
  func.func @transform_0(%arg0: i32) -> (i32, i32) {
    %c0_i32 = arith.constant 0 : i32
    %c0_i32_0 = arith.constant 0 : i32
    return %arg0, %c0_i32 : i32, i32
  }
  func.func @transform_1(%arg0: i32) -> (i32, i32) {
    %c0_i32 = arith.constant 0 : i32
    %c0_i32_0 = arith.constant 0 : i32
    return %arg0, %c0_i32 : i32, i32
  }
  func.func @transform_2(%arg0: i32) -> (i32, i32) {
    %c0_i32 = arith.constant 0 : i32
    %c0_i32_0 = arith.constant 0 : i32
    %c0_i32_1 = arith.constant 0 : i32
    return %c0_i32, %c0_i32_0 : i32, i32
  }
  func.func @transform_3(%arg0: i32) -> (i32, i32) {
    %c0_i32 = arith.constant 0 : i32
    %c0_i32_0 = arith.constant 0 : i32
    %c0_i32_1 = arith.constant 0 : i32
    return %c0_i32, %c0_i32_0 : i32, i32
  }
  func.func @transform_4(%arg0: i32) -> (i32, i32) {
    %c0_i32 = arith.constant 0 : i32
    %c0_i32_0 = arith.constant 0 : i32
    %c0_i32_1 = arith.constant 0 : i32
    return %c0_i32, %c0_i32_0 : i32, i32
  }
  func.func @transform_5(%arg0: i32) -> (i32, i32) {
    %c0_i32 = arith.constant 0 : i32
    %c0_i32_0 = arith.constant 0 : i32
    %c0_i32_1 = arith.constant 0 : i32
    return %c0_i32, %c0_i32_0 : i32, i32
  }
  func.func @transform_6(%arg0: i32) -> (i32, i32) {
    %c0_i32 = arith.constant 0 : i32
    %c0_i32_0 = arith.constant 0 : i32
    %c0_i32_1 = arith.constant 0 : i32
    return %c0_i32, %c0_i32_0 : i32, i32
  }
  func.func @transform_7(%arg0: i32) -> (i32, i32) {
    %c0_i32 = arith.constant 0 : i32
    %c0_i32_0 = arith.constant 0 : i32
    %c0_i32_1 = arith.constant 0 : i32
    return %c0_i32, %c0_i32_0 : i32, i32
  }
  func.func @transform_8(%arg0: i32) -> (i32, i32) {
    %c0_i32 = arith.constant 0 : i32
    %c0_i32_0 = arith.constant 0 : i32
    %c0_i32_1 = arith.constant 0 : i32
    return %c0_i32, %c0_i32_0 : i32, i32
  }
  func.func @transform_9(%arg0: i32) -> (i32, i32) {
    %c0_i32 = arith.constant 0 : i32
    %c0_i32_0 = arith.constant 0 : i32
    return %arg0, %c0_i32 : i32, i32
  }
}

</mosaic_0001>

<bundles_post_ra>
// kernel: tpu_custom_call.1
= control target key start
LH: loop header
LB: loop body
LE: loop exit
PB: predicated region body
PF: predicated region fallthrough
CT: control target
= control target key end

     0   :  { %14 = vsyncpa [#allocation3], 0  ;;  %s676_s0 = inlined_call_operand.vmem [shape: f32[8,12], index: 0, kind: input, shape index: {}]   ;;  %s677_s1 = inlined_call_operand.vmem [shape: f32[8,4], index: 1, kind: input, shape index: {}]   ;;  %s678_s2 = inlined_call_operand.hbm [shape: f32[12,32], index: 2, kind: input, shape index: {}]   ;;  %s679_s3 = inlined_call_operand.vmem [shape: f32[4,32], index: 3, kind: input, shape index: {}]   ;;  %s680_s4 = inlined_call_operand.vmem [shape: f32[1,32], index: 4, kind: input, shape index: {}]   ;;  %s681_s5 = inlined_call_operand.hbm [shape: f32[32,32], index: 5, kind: input, shape index: {}]   ;;  %s682_s6 = inlined_call_operand.vmem [shape: f32[1,32], index: 6, kind: input, shape index: {}]   ;;  %s683_s7 = inlined_call_operand.hbm [shape: f32[32,128], index: 7, kind: input, shape index: {}]   ;;  %s684_s8 = inlined_call_operand.vmem [shape: f32[1,128], index: 8, kind: input, shape index: {}]   ;;  %s685_s9 = inlined_call_operand.hbm [shape: f32[8,128], index: 9, kind: output, shape index: {}]  }
   0x1   :  { %15 = vsyncpa [#allocation6], 0 }
   0x2   :  { %16 = vsyncpa [#allocation4], 0  ;;  %s582_s30 = smov [#allocation5]   ;;  %s583_s11 = smov [#allocation2]  }
   0x3   :  { %s42_s10 = sshll.u32 %s582_s30, 4  ;;  %s26_s12 = sshll.u32 %s583_s11, 4  ;;  %s43_s10 = int_to_ptr.vmem [resolvable:$true] %s42_s10  ;;  %s27_s12 = int_to_ptr.vmem [resolvable:$true] %s26_s12 }
   0x4   :  { %s504_s13 = scalar_lea.vmem %s43_s10, 512  ;;  %p509_p1 = scmp.lt.s32.totalorder %s43_s10, %s43_s10 }
   0x5   :  { %p505_p0 = scmp.ne.s32.totalorder %s43_s10, %s504_s13  ;;  %p510_p2 = scmp.lt.s32.totalorder %s504_s13, %s504_s13 }
   0x7   :  { %p511_p3 = por %p510_p2, %p509_p1 }
   0x9   :  { %p512_p4 = pnand %p511_p3, %p505_p0 }
   0xb   :  { %515 = shalt.err (!%p512_p4)
}
   0xc   :  { %s584_s14 = smov 128   ;;  %s585_s15 = smov 8  }
   0xd   :  { %48 = dma.hbm_to_vmem [thread:$0]  %s681_s5, 512, %s43_s10, [#allocation6], %s584_s14, %s584_s14, %s585_s15  }
   0xe   :  { %s524_s18 = scalar_lea.vmem %s27_s12, 256  ;;  %p529_p6 = scmp.lt.s32.totalorder %s27_s12, %s27_s12 }
   0xf   :  { %p525_p5 = scmp.ne.s32.totalorder %s27_s12, %s524_s18  ;;  %p530_p7 = scmp.lt.s32.totalorder %s524_s18, %s524_s18 }
  0x11   :  { %p531_p8 = por %p530_p7, %p529_p6 }
  0x13   :  { %p532_p9 = pnand %p531_p8, %p525_p5 }
  0x15   :  { %535 = shalt.err (!%p532_p9)
}
  0x16   :  { %32 = dma.hbm_to_vmem [thread:$0]  %s678_s2, 256, %s27_s12, [#allocation3], %s584_s14, %s584_s14, %s585_s15  }
  0x17   :  { %s586_s21 = smov [#allocation7]  }
  0x18   :  { %s56_s22 = sshll.u32 %s586_s21, 4  ;;  %s57_s22 = int_to_ptr.vmem [resolvable:$true] %s56_s22 }
  0x19   :  { %s544_s23 = scalar_lea.vmem %s57_s22, 512  ;;  %p549_p11 = scmp.lt.s32.totalorder %s57_s22, %s57_s22 }
  0x1a   :  { %p545_p10 = scmp.ne.s32.totalorder %s57_s22, %s544_s23  ;;  %p550_p12 = scmp.lt.s32.totalorder %s544_s23, %s544_s23 }
  0x1c   :  { %p551_p13 = por %p550_p12, %p549_p11 }
  0x1e   :  { %p552_p0 = pnand %p551_p13, %p545_p10 }
  0x20   :  { %555 = shalt.err (!%p552_p0)
}
  0x21   :  { %62 = dma.hbm_to_vmem [thread:$0]  %s683_s7, 512, %s57_s22, [#allocation6], %s584_s14, %s584_s14, %s585_s15  }
  0x22   :  { %576 = dma.done.wait [#allocation3], 256  }
  0x23   :  { %577 = vsyncadd [#allocation3], 4294967040 }
  0x24   :  { %578 = dma.done.wait [#allocation6], 1024  }
  0x25   :  { %579 = vsyncadd [#allocation6], 4294966272  ;;  %v587_v0 = vmov 0.0   ;;  %vm588_vm0 = vmmov 0   ;;  %vm83_vm1 = vcmask 1043456   ;;  %vm79_vm2 = vcmask 31744  }
  0x26   :  { %454 = vmatprep.subr.mxu0 %v587_v0  ;;  %459 = vmatprep.subr.mxu1 %v587_v0  ;;  %v78_v1 = vld [vmem:[%s679_s3] sm:$0xf]  ;;  %v76_v2 = vld [vmem:[#allocation2 + $0x8] sm:$0xf]  ;;  %vm157_vm3 = vcmask 97280   ;;  %v244_v8 = vld [vmem:[#allocation5 + $0x8] sm:$0xff] }
  0x27   :  { %456 = vmatprep.mubr.msk.f32.mxu0 %vm588_vm0, %v587_v0  ;;  %463 = vmatprep.mubr.msk.f32.mxu1 %vm588_vm0, %v587_v0  ;;  %v77_v3 = vld [vmem:[%s677_s1] sm:$0xff]  ;;  %v246_v6 = vld [vmem:[#allocation5 + $0x18] sm:$0xff]  ;;  %v243_v9 = vld [vmem:[#allocation5] sm:$0xff]  ;;  %vm254_vm4 = vcmask 261120   ;;  %s589_s10 = smov [#allocation8]  }
  0x28   :  { %455 = vmatpush3.msk.msra.mxu0 %vm83_vm1, %v78_v1  ;;  %460 = vmatpush3.msk.msra.mxu1 %vm83_vm1, %v76_v2  ;;  %v75_v4 = vld [vmem:[#allocation2] sm:$0xff]  ;;  %v332_v10 = vld [vmem:[#allocation7 + $0x18] sm:$0xff]  ;;  %v330_v20 = vld [vmem:[#allocation7 + $0x8] sm:$0xff]  ;;  %s420_s11 = sshll.u32 %s589_s10, 4  ;;  %s421_s11 = int_to_ptr.vmem [resolvable:$true] %s420_s11 }
  0x29   :  { %v74_v5 = vld [vmem:[%s676_s0] sm:$0xff]  ;;  %457 = vmatmul.mubr.msk.f32.vlgmr.msra.gmra.mxu0 %vm79_vm2, %v77_v3  ;;  %461 = vmatprep.subr.mxu1 %v587_v0  ;;  %v329_v21 = vld [vmem:[#allocation7] sm:$0xff]  ;;  %s556_s12 = scalar_lea.vmem %s421_s11, 128  ;;  %p561_p2 = scmp.lt.s32.totalorder %s421_s11, %s421_s11 }
  0x2a   :  { %462 = vmatpush3.msra.mxu1 %v75_v4  ;;  %466 = vmatprep.subr.mxu0 %v587_v0  ;;  %v245_v7 = vld [vmem:[#allocation5 + $0x10] sm:$0xff]  ;;  %p557_p1 = scmp.ne.s32.totalorder %s421_s11, %s556_s12  ;;  %p562_p3 = scmp.lt.s32.totalorder %s556_s12, %s556_s12 }
  0x2b   :  { %464 = vmatmul.mubr.msk.f32.vlgmr.msra.gmra.mxu1 %vm157_vm3, %v74_v5  ;;  %474 = vmatprep.mubr.msk.f32.mxu0 %vm588_vm0, %v587_v0  ;;  %v434_v14 = vld [vmem:[%s680_s4] ss:$0 sm:$0xff] }
  0x2c   :  { %477 = vmatprep.subr.mxu1 %v587_v0  ;;  %485 = vmatprep.mubr.msk.f32.mxu1 %vm588_vm0, %v587_v0  ;;  %v331_v19 = vld [vmem:[#allocation7 + $0x10] sm:$0xff]  ;;  %p563_p4 = por %p562_p3, %p561_p2 }
  0x2d   :  { %467 = vmatpush3.msra.mxu0 %v246_v6  ;;  %478 = vmatpush3.msra.mxu1 %v332_v10  ;;  %v435_v22 = vld [vmem:[%s682_s6] ss:$0 sm:$0xff] }
  0x2e   :  { %468 = vmatprep.subr.mxu0 %v587_v0  ;;  %479 = vmatprep.subr.mxu1 %v587_v0  ;;  %v437_v27 = vld [vmem:[%s684_s8] ss:$0 sm:$0xff]  ;;  %p564_p5 = pnand %p563_p4, %p557_p1 }
  0x2f   :  { %469 = vmatpush3.msra.mxu0 %v245_v7  ;;  %480 = vmatpush3.msra.mxu1 %v331_v19 }
  0x30   :  { %470 = vmatprep.subr.mxu0 %v587_v0  ;;  %481 = vmatprep.subr.mxu1 %v587_v0 }
  0x31   :  { %471 = vmatpush3.msra.mxu0 %v244_v8  ;;  %482 = vmatpush3.msra.mxu1 %v330_v20 }
  0x32   :  { %472 = vmatprep.subr.mxu0 %v587_v0  ;;  %483 = vmatprep.subr.mxu1 %v587_v0 }
  0x33   :  { %473 = vmatpush3.msra.mxu0 %v243_v9  ;;  %484 = vmatpush3.msra.mxu1 %v329_v21 }
  0xe9   :  { %v153_v11 = vpop.f32.mrf.mxu0 }
  0xeb   :  { %v458_v12 = vpop.f32.mrf.mxu0  ;;  %v230_v13 = vpop.f32.mrf.mxu1 }
  0xec   :  { %v231_v15 = vadd.f32 %v230_v13, %v153_v11 }
  0xed   :  { %v465_v16 = vpop.f32.mrf.mxu1 }
  0xee   :  { %v241_v17 = vadd.f32 %v434_v14, %v231_v15 }
  0xf0   :  { %v242_v18 = vmax.f32 %v241_v17, 0.0 }
  0xf2   :  { %475 = vmatmul.mubr.msk.f32.vlgmr.msra.gmra.mxu0 %vm254_vm4, %v242_v18 }
 0x1b2   :  { %v324_v23 = vpop.f32.mrf.mxu0 }
 0x1b3   :  { %v325_v24 = vadd.f32 %v435_v22, %v324_v23 }
 0x1b4   :  { %v476_v25 = vpop.f32.mrf.mxu0 }
 0x1b5   :  { %v328_v26 = vmax.f32 %v325_v24, 0.0 }
 0x1b7   :  { %486 = vmatmul.mubr.msk.f32.vlgmr.msra.gmra.mxu1 %vm254_vm4, %v328_v26 }
 0x277   :  { %v409_v28 = vpop.f32.mrf.mxu1 }
 0x278   :  { %v410_v29 = vadd.f32 %v437_v27, %v409_v28 }
 0x279   :  { %v487_v30 = vpop.f32.mrf.mxu1 }
 0x27a   :  { %413 = vst [vmem:[#allocation8] sm:$0xff] %v410_v29 }
 0x27b   :  { %567 = shalt.err (!%p564_p5)
}
 0x27c   :  { %423 = dma.vmem_to_hbm [thread:$0]  %s421_s11, 128, %s685_s9, [#allocation4]  }
 0x27d   :  { %580 = dma.done.wait [#allocation4], 128  }
 0x27e   :  { %581 = vsyncadd [#allocation4], 4294967168 }
 0x27f   :  { %427 = vsyncpa [#allocation3], 1 }
 0x280   :  { %428 = vsyncpa [#allocation6], 1 }
 0x281   :  { %429 = vsyncpa [#allocation4], 1 }

</bundles_post_ra>
